<compile_context>
chip_gen: v6e
topology: v6e:2x2x1
jax: 0.10.0
libtpu: 0.0.40
codegen_flags: <defaults>
</compile_context>

<pallas_src>
import functools

import jax
import jax.numpy as jnp
import numpy as np
from jax.experimental import pallas as pl
from jax.experimental.pallas import tpu as pltpu


def _round_up(a, b):
    return (a + b - 1) // b * b


def _round_down(a, b):
    return (a // b) * b


# ----------------------------------------------------------------------------
# Kernel: accumulate per-row sums over H*W chunks, finalize with 1/HW.
#   x_ref  : (ROWS, CHUNK)  rows = flattened (n, c), lanes = one H*W chunk
#   o_ref  : (ROWS, 1)      per-row mean, written on the last chunk only
#   acc_ref: (ROWS, 1) f32  VMEM scratch, resident across the chunk axis
# ----------------------------------------------------------------------------
def _gap_kernel(x_ref, o_ref, acc_ref, *, inv_hw):
    k = pl.program_id(1)

    @pl.when(k == 0)
    def _():
        acc_ref[...] = jnp.zeros_like(acc_ref)

    # Accumulate in f32 without materializing an f32 copy of the whole tile.
    acc_ref[...] += jnp.sum(x_ref[...], axis=-1, keepdims=True,
                            dtype=jnp.float32)

    @pl.when(k == pl.num_programs(1) - 1)
    def _():
        # Scale by 1/(true H*W) exactly once, at finalize.
        o_ref[...] = (acc_ref[...] * inv_hw).astype(o_ref.dtype)


def global_avg_pool2d(x_nchw):
    """(N, C, H, W) -> (N, C, 1, 1); mean over spatial dims (matches torch)."""
    N, C, H, W = x_nchw.shape
    HW = H * W
    R = N * C
    x = x_nchw.reshape(R, HW)                       # contiguous, free reshape
    itemsize = x.dtype.itemsize

    # ---- tile sizing -------------------------------------------------------
    # Lane (HW) chunk: multiple of 128, capped at 2048 lanes per step.
    chunk = min(_round_up(HW, 128), 2048)
    # Row block: multiple of 8, target up to 1024 rows, bounded so the
    # double-buffered input block stays ~<=16 MiB (fits v7x's 64 MiB VMEM
    # with headroom; also fine on v5e/v6e).
    rows_budget = max(8, _round_down((8 * 1024 * 1024) // (chunk * itemsize), 8))
    rows = max(8, min(_round_up(R, 8), 1024, rows_budget))

    # Zero-pad up to whole tiles.  Lane padding is zeros => exact sum (we
    # divide by the true HW); padded rows are sliced off below.
    R_pad = _round_up(R, rows)
    HW_pad = _round_up(HW, chunk)
    if (R_pad, HW_pad) != (R, HW):
        x = jnp.pad(x, ((0, R_pad - R), (0, HW_pad - HW)))

    grid = (R_pad // rows, HW_pad // chunk)

    # Explicit scoped-VMEM limit: double-buffered in/out blocks + scratch.
    in_blk = rows * chunk * itemsize
    out_blk = rows * 128 * itemsize          # (rows, 1) pads to 128 lanes
    acc_blk = rows * 128 * 4
    vmem_limit = int(min(48 << 20,
                         max(8 << 20,
                             2 * in_blk + 2 * out_blk + acc_blk + (2 << 20))))

    out = pl.pallas_call(
        functools.partial(_gap_kernel, inv_hw=1.0 / HW),
        out_shape=jax.ShapeDtypeStruct((R_pad, 1), x_nchw.dtype),
        grid=grid,
        in_specs=[pl.BlockSpec((rows, chunk), lambda i, k: (i, k))],
        out_specs=pl.BlockSpec((rows, 1), lambda i, k: (i, 0)),
        scratch_shapes=[pltpu.VMEM((rows, 1), jnp.float32)],
        compiler_params=pltpu.CompilerParams(
            dimension_semantics=("parallel", "arbitrary"),
            vmem_limit_bytes=vmem_limit),
    )(x)
    # TODO(synk): for small non-128-multiple HW (e.g. 7x7 GAP heads), add a
    # channels-on-lanes path ((N, HW, C_tile) blocks, sublane reduction) to
    # avoid ~60% wasted lane bandwidth on the mem-bound load path.

    return out[:R].reshape(N, C, 1, 1)


# ----------------------------------------------------------------------------
# Pure-JAX reference
# ----------------------------------------------------------------------------
def ref_global_avg_pool2d(x_nchw):
    N, C, H, W = x_nchw.shape
    return x_nchw.reshape(N, C, H * W).mean(axis=2).reshape(N, C, 1, 1)


# ----------------------------------------------------------------------------
if __name__ == "__main__":
    key = jax.random.PRNGKey(0)
    N, C, H, W = 2, 4, 16, 16

    x = jax.random.normal(key, (N, C, H, W), jnp.float32)  # NCHW, like torch

    out = jax.block_until_ready(global_avg_pool2d(x))
    ref = jax.block_until_ready(ref_global_avg_pool2d(x))

    assert out.shape == (N, C, 1, 1), out.shape
    np.testing.assert_allclose(np.asarray(out), np.asarray(ref),
                               rtol=1e-5, atol=1e-5)
    print("KERNEL_OK")
</pallas_src>

<mosaic_0001>
module attributes {stable_mosaic.version = 11 : i64} {
  func.func @_gap_kernel(%arg0: i32, %arg1: i32, %arg2: memref<8x256xf32, #tpu.memory_space<vmem>>, %arg3: memref<8x1xf32, #tpu.memory_space<vmem>>, %arg4: memref<8x1xf32, #tpu.memory_space<vmem>>) attributes {dimension_semantics = [#tpu.dimension_semantics<parallel>, #tpu.dimension_semantics<arbitrary>], iteration_bounds = array<i64: 1, 1>, scalar_prefetch = 0 : i64, scratch_operands = 1 : i64, tpu.core_type = #tpu.core_type<tc>, window_params = [{transform_indices = @transform_0, window_bounds = array<i64: 8, 256>}, {transform_indices = @transform_1, window_bounds = array<i64: 8, 1>}]} {
    %c0_i32 = arith.constant 0 : i32
    %0 = arith.cmpi eq, %arg1, %c0_i32 : i32
    %1 = arith.extui %0 : i1 to i32
    %c0_i32_0 = arith.constant 0 : i32
    %2 = arith.cmpi ne, %1, %c0_i32_0 : i32
    scf.if %2 {
      %cst_8 = arith.constant 0.000000e+00 : f32
      %12 = vector.broadcast %cst_8 : f32 to vector<8x1xf32>
      %c0_9 = arith.constant 0 : index
      %c0_10 = arith.constant 0 : index
      %13 = vector.load %arg4[%c0_9, %c0_10] : memref<8x1xf32, #tpu.memory_space<vmem>>, vector<8x1xf32>
      tpu.vector_store %arg4[%c0_9, %c0_10], %12 {strides = array<i32>} : memref<8x1xf32, #tpu.memory_space<vmem>>, vector<8x1xf32>,
    } else {
    }
    %c0 = arith.constant 0 : index
    %c0_1 = arith.constant 0 : index
    %3 = vector.load %arg4[%c0, %c0_1] : memref<8x1xf32, #tpu.memory_space<vmem>>, vector<8x1xf32>
    %c0_2 = arith.constant 0 : index
    %c0_3 = arith.constant 0 : index
    %4 = vector.load %arg2[%c0_2, %c0_3] : memref<8x256xf32, #tpu.memory_space<vmem>>, vector<8x256xf32>
    %cst = arith.constant dense<0.000000e+00> : vector<8xf32>
    %5 = vector.multi_reduction <add>, %4, %cst [1] : vector<8x256xf32> to vector<8xf32>
    %6 = vector.shape_cast %5 : vector<8xf32> to vector<8x1xf32>
    %7 = arith.addf %3, %6 : vector<8x1xf32>
    %c0_4 = arith.constant 0 : index
    %c0_5 = arith.constant 0 : index
    %8 = vector.load %arg4[%c0_4, %c0_5] : memref<8x1xf32, #tpu.memory_space<vmem>>, vector<8x1xf32>
    tpu.vector_store %arg4[%c0_4, %c0_5], %7 {strides = array<i32>} : memref<8x1xf32, #tpu.memory_space<vmem>>, vector<8x1xf32>,
    %c0_i32_6 = arith.constant 0 : i32
    %9 = arith.cmpi eq, %arg1, %c0_i32_6 : i32
    %10 = arith.extui %9 : i1 to i32
    %c0_i32_7 = arith.constant 0 : i32
    %11 = arith.cmpi ne, %10, %c0_i32_7 : i32
    scf.if %11 {
      %c0_8 = arith.constant 0 : index
      %c0_9 = arith.constant 0 : index
      %12 = vector.load %arg4[%c0_8, %c0_9] : memref<8x1xf32, #tpu.memory_space<vmem>>, vector<8x1xf32>
      %cst_10 = arith.constant 3.906250e-03 : f32
      %13 = vector.broadcast %cst_10 : f32 to vector<8x1xf32>
      %14 = arith.mulf %12, %13 : vector<8x1xf32>
      %c0_11 = arith.constant 0 : index
      %c0_12 = arith.constant 0 : index
      %15 = vector.load %arg3[%c0_11, %c0_12] : memref<8x1xf32, #tpu.memory_space<vmem>>, vector<8x1xf32>
      tpu.vector_store %arg3[%c0_11, %c0_12], %14 {strides = array<i32>} : memref<8x1xf32, #tpu.memory_space<vmem>>, vector<8x1xf32>,
    } else {
    }
    return
  }
  func.func @transform_0(%arg0: i32, %arg1: i32) -> (i32, i32) {
    %c0_i32 = arith.constant 0 : i32
    return %arg0, %arg1 : i32, i32
  }
  func.func @transform_1(%arg0: i32, %arg1: i32) -> (i32, i32) {
    %c0_i32 = arith.constant 0 : i32
    %c0_i32_0 = arith.constant 0 : i32
    return %arg0, %c0_i32 : i32, i32
  }
}

</mosaic_0001>

<bundles_post_ra>
// kernel: tpu_custom_call.1
= control target key start
LH: loop header
LB: loop body
LE: loop exit
PB: predicated region body
PF: predicated region fallthrough
CT: control target
= control target key end

     0   :  { %6 = vsyncpa [#allocation4], 0  ;;  %s70_s6 = smov [#allocation3]   ;;  %s88_s0 = inlined_call_operand.hbm [shape: f32[8,256], index: 0, kind: input, shape index: {}]   ;;  %s89_s1 = inlined_call_operand.vmem [shape: f32[8,1], index: 1, kind: output, shape index: {}]  }
   0x1   :  { %s13_s7 = sshll.u32 %s70_s6, 4  ;;  %s14_s7 = int_to_ptr.vmem [resolvable:$true] %s13_s7 }
   0x2   :  { %s56_s8 = scalar_lea.vmem %s14_s7, 256  ;;  %p61_p1 = scmp.lt.s32.totalorder %s14_s7, %s14_s7 }
   0x3   :  { %p57_p0 = scmp.ne.s32.totalorder %s14_s7, %s56_s8  ;;  %p62_p2 = scmp.lt.s32.totalorder %s56_s8, %s56_s8 }
   0x5   :  { %p63_p3 = por %p62_p2, %p61_p1 }
   0x7   :  { %p64_p4 = pnand %p63_p3, %p57_p0 }
   0x9   :  { %67 = shalt.err (!%p64_p4)
}
   0xa   :  { %16 = dma.hbm_to_vmem [thread:$0]  %s88_s0, 256, %s14_s7, [#allocation4]  }
   0xb   :  { %68 = dma.done.wait [#allocation4], 256  }
   0xc   :  { %69 = vsyncadd [#allocation4], 4294967040  ;;  %vm24_vm0 = vcmask 7168   ;;  %v71_v0 = vmov 0.0   ;;  %v27_v1 = vld [vmem:[#allocation3] sm:$0xff]  ;;  %v28_v2 = vld [vmem:[#allocation3 + $0x8] sm:$0xff] }
   0xd   :  { %25 = vst.msk [vmem:[#allocation2] sm:$0xff] %vm24_vm0, %v71_v0  ;;  %v29_v3 = vadd.f32 %v28_v2, %v27_v1 }
   0xf   :  { %30 = vadd.xlane.f32.xlu0 %v29_v3 }
  0x14   :  { %v26_v4 = vld [vmem:[#allocation2] sm:$0xff] }
  0x98   :  { %v31_v5 = vpop.xlane.xlu0 %30 }
  0x99   :  { %v32_v6 = vadd.f32 %v31_v5, %v26_v4 }
  0x9b   :  { %34 = vst.msk [vmem:[#allocation2] sm:$0xff] %vm24_vm0, %v32_v6 }
  0xa2   :  { %v38_v7 = vld [vmem:[#allocation2] sm:$0xff] }
  0xa3   :  { %v39_v8 = vmul.f32 0.00390625, %v38_v7 }
  0xa5   :  { %40 = vst.msk [vmem:[%s89_s1] sm:$0xff] %vm24_vm0, %v39_v8 }
  0xa6   :  { %45 = vsyncpa [#allocation4], 1 }

</bundles_post_ra>
